<compile_context>
chip_gen: v7x
topology: tpu7x:2x2x1
jax: 0.10.0
libtpu: 0.0.40
codegen_flags: <defaults>
</compile_context>

<pallas_src>
import functools

import jax
import jax.numpy as jnp
from jax.experimental import pallas as pl
from jax.experimental.pallas import tpu as pltpu


def _single_layer_kernel(x_ref, w_ref, o_ref, *, H, W):
    # x_ref: (N, C, H*W)   raw x, flattened spatially (lane-dense)
    # w_ref: (G, 9*C)      conv weight, column index = (kh*3 + kw)*C + c
    # o_ref: (N, C+G, H*W) output = concat(relu(x), conv3x3(relu(x))) per image
    N, C, HW = x_ref.shape
    wmat = w_ref[...]                                   # (G, 9C)

    # ReLU once for the whole batch (inplace-relu semantics: these values are also
    # the first C output channels).
    xr = jnp.maximum(x_ref[...], 0.0)                   # (N, C, HW), f32 on VPU

    # Column index of each flattened spatial position; only the left/right image
    # borders need masking (top/bottom rows are handled by the zero fill of the
    # flat shifts below).
    col = jax.lax.broadcasted_iota(jnp.int32, (C, HW), 1) % W
    not_first_col = col != 0
    not_last_col = col != (W - 1)

    for n in range(N):                                  # N=2, unrolled at trace time
        xrn = xr[n]                                     # (C, HW)

        # Build im2col patches (9C, HW): tap (kh, kw) wants source pixel
        # (h + kh - 1, w + kw - 1), i.e. flat index p + s with s = (kh-1)*W + (kw-1).
        # A static lane shift with zero fill handles the top/bottom halo; the column
        # mask kills the wrap-around across image rows for kw != 1.
        taps = []
        for kh in range(3):
            for kw in range(3):
                s = (kh - 1) * W + (kw - 1)
                if s == 0:
                    t = xrn
                elif s > 0:
                    t = jnp.concatenate(
                        [xrn[:, s:], jnp.zeros((C, s), xrn.dtype)], axis=1)
                else:
                    t = jnp.concatenate(
                        [jnp.zeros((C, -s), xrn.dtype), xrn[:, :HW + s]], axis=1)
                if kw == 0:
                    t = jnp.where(not_first_col, t, 0.0)
                elif kw == 2:
                    t = jnp.where(not_last_col, t, 0.0)
                taps.append(t)
        patches = jnp.concatenate(taps, axis=0)         # (9C, HW)

        # Single MXU matmul, K = 9C; result is already lane-dense (G, HW).
        conv = jnp.dot(wmat, patches,
                       preferred_element_type=jnp.float32)  # (G, HW)

        # One full-width store of the channel-concatenated result.
        o_ref[n] = jnp.concatenate([xrn, conv], axis=0).astype(o_ref.dtype)


def single_layer_forward(x_nchw, w_oihw, use_dropout=False, training=False):
    """Pallas implementation of SingleLayer.forward.

    x_nchw: (N, C, H, W); w_oihw: (G, C, 3, 3) (PyTorch layout, no bias).
    """
    N, C, H, W = x_nchw.shape
    G = w_oihw.shape[0]

    if use_dropout and training:
        # TODO(synk): training-mode dropout (p=0.2, scale 1/0.8) via pltpu.prng_* not wired in.
        raise NotImplementedError("training-mode dropout not implemented")
    # eval-mode nn.Dropout is identity -> nothing to do when use_dropout=True.

    # Contiguous reshape only -- no transpose, no pad, no extra HBM pass.
    x_flat = x_nchw.reshape(N, C, H * W)
    # (G, C, 3, 3) -> (G, 3, 3, C) -> (G, 9C); column = (kh*3 + kw)*C + c
    # (one-time host-side weight prep; loads as one contiguous MXU operand).
    w_flat = jnp.transpose(w_oihw, (0, 2, 3, 1)).reshape(G, 9 * C)

    out_flat = pl.pallas_call(
        functools.partial(_single_layer_kernel, H=H, W=W),
        out_shape=jax.ShapeDtypeStruct((N, C + G, H * W), x_nchw.dtype),
        grid=(1,),                                       # single step: whole batch
        in_specs=[
            pl.BlockSpec((N, C, H * W), lambda i: (0, 0, 0)),
            pl.BlockSpec((G, 9 * C), lambda i: (0, 0)),
        ],
        out_specs=pl.BlockSpec((N, C + G, H * W), lambda i: (0, 0, 0)),
        compiler_params=pltpu.CompilerParams(
            dimension_semantics=("arbitrary",)),
    )(x_flat, w_flat)

    # Contiguous reshape back to NCHW -- no output transpose needed.
    return out_flat.reshape(N, C + G, H, W)


def _reference_forward(x_nchw, w_oihw):
    rx = jnp.maximum(x_nchw, 0.0)
    conv = jax.lax.conv_general_dilated(
        rx, w_oihw, window_strides=(1, 1), padding=((1, 1), (1, 1)),
        dimension_numbers=("NCHW", "OIHW", "NCHW"))
    return jnp.concatenate([rx, conv], axis=1)   # inplace relu => cat relu(x)


if __name__ == "__main__":
    # Module config: nChannels=4, growthRate=8, use_dropout=False
    N, C, H, W, G = 2, 4, 16, 16, 8

    key = jax.random.PRNGKey(0)
    kx, kw = jax.random.split(key)
    x = jax.random.normal(kx, (N, C, H, W), dtype=jnp.float32)
    # deterministic conv weight, PyTorch layout (G, C, 3, 3), no bias
    w = (jax.random.normal(kw, (G, C, 3, 3), dtype=jnp.float32)
         * (1.0 / (3.0 * (C * 9) ** 0.5)))

    out = single_layer_forward(x, w, use_dropout=False)
    out = jax.block_until_ready(out)

    ref = _reference_forward(x, w)
    assert out.shape == (N, C + G, H, W), out.shape
    assert jnp.allclose(out, ref, atol=1e-4, rtol=1e-4), float(
        jnp.max(jnp.abs(out - ref)))

    print("KERNEL_OK")
</pallas_src>

<mosaic_0001>
module attributes {stable_mosaic.version = 11 : i64} {
  func.func @_single_layer_kernel(%arg0: i32, %arg1: memref<2x4x256xf32, #tpu.memory_space<vmem>>, %arg2: memref<8x36xf32, #tpu.memory_space<vmem>>, %arg3: memref<2x12x256xf32, #tpu.memory_space<vmem>>) attributes {dimension_semantics = [#tpu.dimension_semantics<arbitrary>], iteration_bounds = array<i64: 1>, scalar_prefetch = 0 : i64, scratch_operands = 0 : i64, tpu.core_type = #tpu.core_type<tc>, window_params = [{pipeline_mode = #tpu.pipeline_mode<synchronous>, transform_indices = @transform_0, window_bounds = array<i64: 2, 4, 256>}, {pipeline_mode = #tpu.pipeline_mode<synchronous>, transform_indices = @transform_1, window_bounds = array<i64: 8, 36>}, {pipeline_mode = #tpu.pipeline_mode<synchronous>, transform_indices = @transform_2, window_bounds = array<i64: 2, 12, 256>}]} {
    %c0 = arith.constant 0 : index
    %c0_0 = arith.constant 0 : index
    %0 = vector.load %arg2[%c0, %c0_0] : memref<8x36xf32, #tpu.memory_space<vmem>>, vector<8x36xf32>
    %c0_1 = arith.constant 0 : index
    %c0_2 = arith.constant 0 : index
    %c0_3 = arith.constant 0 : index
    %1 = vector.load %arg1[%c0_1, %c0_2, %c0_3] : memref<2x4x256xf32, #tpu.memory_space<vmem>>, vector<2x4x256xf32>
    %cst = arith.constant 0.000000e+00 : f32
    %2 = vector.broadcast %cst : f32 to vector<2x4x256xf32>
    %3 = arith.maximumf %1, %2 : vector<2x4x256xf32>
    %4 = tpu.iota {dimensions = array<i32: 1>} : vector<4x256xi32>
    %c16_i32 = arith.constant 16 : i32
    %c0_i32 = arith.constant 0 : i32
    %5 = arith.cmpi eq, %c16_i32, %c0_i32 : i32
    %c1_i32 = arith.constant 1 : i32
    %6 = arith.select %5, %c1_i32, %c16_i32 : i32
    %7 = vector.broadcast %6 : i32 to vector<4x256xi32>
    %8 = arith.remsi %4, %7 : vector<4x256xi32>
    %c0_i32_4 = arith.constant 0 : i32
    %9 = vector.broadcast %c0_i32_4 : i32 to vector<4x256xi32>
    %10 = arith.cmpi ne, %8, %9 : vector<4x256xi32>
    %c0_i32_5 = arith.constant 0 : i32
    %11 = vector.broadcast %c0_i32_5 : i32 to vector<4x256xi32>
    %12 = arith.cmpi slt, %8, %11 : vector<4x256xi32>
    %c0_i32_6 = arith.constant 0 : i32
    %13 = arith.cmpi slt, %6, %c0_i32_6 : i32
    %14 = vector.broadcast %13 : i1 to vector<4x256xi1>
    %15 = vector.broadcast %14 : vector<4x256xi1> to vector<4x256xi1>
    %16 = arith.xori %12, %15 : vector<4x256xi1>
    %17 = arith.andi %16, %10 : vector<4x256xi1>
    %18 = vector.broadcast %6 : i32 to vector<4x256xi32>
    %19 = arith.addi %8, %18 : vector<4x256xi32>
    %20 = arith.select %17, %19, %8 : vector<4x256xi1>, vector<4x256xi32>
    %c0_i32_7 = arith.constant 0 : i32
    %21 = vector.broadcast %c0_i32_7 : i32 to vector<4x256xi32>
    %22 = arith.cmpi ne, %20, %21 : vector<4x256xi32>
    %c15_i32 = arith.constant 15 : i32
    %23 = vector.broadcast %c15_i32 : i32 to vector<4x256xi32>
    %24 = arith.cmpi ne, %20, %23 : vector<4x256xi32>
    %25 = vector.extract_strided_slice %3 {offsets = [0, 0, 0], sizes = [1, 4, 256], strides = [1, 1, 1]} : vector<2x4x256xf32> to vector<1x4x256xf32>
    %26 = vector.shape_cast %25 : vector<1x4x256xf32> to vector<4x256xf32>
    %cst_8 = arith.constant 0.000000e+00 : f32
    %27 = vector.broadcast %cst_8 : f32 to vector<4x17xf32>
    %28 = vector.extract_strided_slice %26 {offsets = [0, 0], sizes = [4, 239], strides = [1, 1]} : vector<4x256xf32> to vector<4x239xf32>
    %29 = tpu.concatenate %27, %28 in 1 : vector<4x17xf32>, vector<4x239xf32> -> vector<4x256xf32>
    %cst_9 = arith.constant 0.000000e+00 : f32
    %30 = vector.broadcast %cst_9 : f32 to vector<4x256xf32>
    %31 = arith.select %22, %29, %30 : vector<4x256xi1>, vector<4x256xf32>
    %cst_10 = arith.constant 0.000000e+00 : f32
    %32 = vector.broadcast %cst_10 : f32 to vector<4x16xf32>
    %33 = vector.extract_strided_slice %26 {offsets = [0, 0], sizes = [4, 240], strides = [1, 1]} : vector<4x256xf32> to vector<4x240xf32>
    %34 = tpu.concatenate %32, %33 in 1 : vector<4x16xf32>, vector<4x240xf32> -> vector<4x256xf32>
    %cst_11 = arith.constant 0.000000e+00 : f32
    %35 = vector.broadcast %cst_11 : f32 to vector<4x15xf32>
    %36 = vector.extract_strided_slice %26 {offsets = [0, 0], sizes = [4, 241], strides = [1, 1]} : vector<4x256xf32> to vector<4x241xf32>
    %37 = tpu.concatenate %35, %36 in 1 : vector<4x15xf32>, vector<4x241xf32> -> vector<4x256xf32>
    %cst_12 = arith.constant 0.000000e+00 : f32
    %38 = vector.broadcast %cst_12 : f32 to vector<4x256xf32>
    %39 = arith.select %24, %37, %38 : vector<4x256xi1>, vector<4x256xf32>
    %cst_13 = arith.constant 0.000000e+00 : f32
    %40 = vector.broadcast %cst_13 : f32 to vector<4x1xf32>
    %41 = vector.extract_strided_slice %26 {offsets = [0, 0], sizes = [4, 255], strides = [1, 1]} : vector<4x256xf32> to vector<4x255xf32>
    %42 = tpu.concatenate %40, %41 in 1 : vector<4x1xf32>, vector<4x255xf32> -> vector<4x256xf32>
    %cst_14 = arith.constant 0.000000e+00 : f32
    %43 = vector.broadcast %cst_14 : f32 to vector<4x256xf32>
    %44 = arith.select %22, %42, %43 : vector<4x256xi1>, vector<4x256xf32>
    %45 = vector.extract_strided_slice %26 {offsets = [0, 1], sizes = [4, 255], strides = [1, 1]} : vector<4x256xf32> to vector<4x255xf32>
    %cst_15 = arith.constant 0.000000e+00 : f32
    %46 = vector.broadcast %cst_15 : f32 to vector<4x1xf32>
    %47 = tpu.concatenate %45, %46 in 1 : vector<4x255xf32>, vector<4x1xf32> -> vector<4x256xf32>
    %cst_16 = arith.constant 0.000000e+00 : f32
    %48 = vector.broadcast %cst_16 : f32 to vector<4x256xf32>
    %49 = arith.select %24, %47, %48 : vector<4x256xi1>, vector<4x256xf32>
    %50 = vector.extract_strided_slice %26 {offsets = [0, 15], sizes = [4, 241], strides = [1, 1]} : vector<4x256xf32> to vector<4x241xf32>
    %cst_17 = arith.constant 0.000000e+00 : f32
    %51 = vector.broadcast %cst_17 : f32 to vector<4x15xf32>
    %52 = tpu.concatenate %50, %51 in 1 : vector<4x241xf32>, vector<4x15xf32> -> vector<4x256xf32>
    %cst_18 = arith.constant 0.000000e+00 : f32
    %53 = vector.broadcast %cst_18 : f32 to vector<4x256xf32>
    %54 = arith.select %22, %52, %53 : vector<4x256xi1>, vector<4x256xf32>
    %55 = vector.extract_strided_slice %26 {offsets = [0, 16], sizes = [4, 240], strides = [1, 1]} : vector<4x256xf32> to vector<4x240xf32>
    %cst_19 = arith.constant 0.000000e+00 : f32
    %56 = vector.broadcast %cst_19 : f32 to vector<4x16xf32>
    %57 = tpu.concatenate %55, %56 in 1 : vector<4x240xf32>, vector<4x16xf32> -> vector<4x256xf32>
    %58 = vector.extract_strided_slice %26 {offsets = [0, 17], sizes = [4, 239], strides = [1, 1]} : vector<4x256xf32> to vector<4x239xf32>
    %cst_20 = arith.constant 0.000000e+00 : f32
    %59 = vector.broadcast %cst_20 : f32 to vector<4x17xf32>
    %60 = tpu.concatenate %58, %59 in 1 : vector<4x239xf32>, vector<4x17xf32> -> vector<4x256xf32>
    %cst_21 = arith.constant 0.000000e+00 : f32
    %61 = vector.broadcast %cst_21 : f32 to vector<4x256xf32>
    %62 = arith.select %24, %60, %61 : vector<4x256xi1>, vector<4x256xf32>
    %63 = tpu.concatenate %31, %34, %39, %44, %26, %49, %54, %57, %62 in 0 : vector<4x256xf32>, vector<4x256xf32>, vector<4x256xf32>, vector<4x256xf32>, vector<4x256xf32>, vector<4x256xf32>, vector<4x256xf32>, vector<4x256xf32>, vector<4x256xf32> -> vector<36x256xf32>
    %cst_22 = arith.constant dense<0.000000e+00> : vector<8x256xf32>
    %64 = tpu.matmul %0, %63, %cst_22 {dimension_numbers = #tpu.dot_dimension_numbers<[1], [0], [0], [1], [0, 0, 1, 1], [], []>} : vector<8x36xf32>, vector<36x256xf32>, vector<8x256xf32> -> vector<8x256xf32>
    %65 = tpu.concatenate %26, %64 in 0 : vector<4x256xf32>, vector<8x256xf32> -> vector<12x256xf32>
    %c0_23 = arith.constant 0 : index
    %c0_24 = arith.constant 0 : index
    %c0_25 = arith.constant 0 : index
    %66 = vector.load %arg3[%c0_23, %c0_24, %c0_25] : memref<2x12x256xf32, #tpu.memory_space<vmem>>, vector<1x12x256xf32>
    %67 = vector.shape_cast %66 : vector<1x12x256xf32> to vector<12x256xf32>
    %68 = vector.shape_cast %65 : vector<12x256xf32> to vector<1x12x256xf32>
    tpu.vector_store %arg3[%c0_23, %c0_24, %c0_25], %68 {strides = array<i32>} : memref<2x12x256xf32, #tpu.memory_space<vmem>>, vector<1x12x256xf32>,
    %69 = vector.extract_strided_slice %3 {offsets = [1, 0, 0], sizes = [1, 4, 256], strides = [1, 1, 1]} : vector<2x4x256xf32> to vector<1x4x256xf32>
    %70 = vector.shape_cast %69 : vector<1x4x256xf32> to vector<4x256xf32>
    %cst_26 = arith.constant 0.000000e+00 : f32
    %71 = vector.broadcast %cst_26 : f32 to vector<4x17xf32>
    %72 = vector.extract_strided_slice %70 {offsets = [0, 0], sizes = [4, 239], strides = [1, 1]} : vector<4x256xf32> to vector<4x239xf32>
    %73 = tpu.concatenate %71, %72 in 1 : vector<4x17xf32>, vector<4x239xf32> -> vector<4x256xf32>
    %cst_27 = arith.constant 0.000000e+00 : f32
    %74 = vector.broadcast %cst_27 : f32 to vector<4x256xf32>
    %75 = arith.select %22, %73, %74 : vector<4x256xi1>, vector<4x256xf32>
    %cst_28 = arith.constant 0.000000e+00 : f32
    %76 = vector.broadcast %cst_28 : f32 to vector<4x16xf32>
    %77 = vector.extract_strided_slice %70 {offsets = [0, 0], sizes = [4, 240], strides = [1, 1]} : vector<4x256xf32> to vector<4x240xf32>
    %78 = tpu.concatenate %76, %77 in 1 : vector<4x16xf32>, vector<4x240xf32> -> vector<4x256xf32>
    %cst_29 = arith.constant 0.000000e+00 : f32
    %79 = vector.broadcast %cst_29 : f32 to vector<4x15xf32>
    %80 = vector.extract_strided_slice %70 {offsets = [0, 0], sizes = [4, 241], strides = [1, 1]} : vector<4x256xf32> to vector<4x241xf32>
    %81 = tpu.concatenate %79, %80 in 1 : vector<4x15xf32>, vector<4x241xf32> -> vector<4x256xf32>
    %cst_30 = arith.constant 0.000000e+00 : f32
    %82 = vector.broadcast %cst_30 : f32 to vector<4x256xf32>
    %83 = arith.select %24, %81, %82 : vector<4x256xi1>, vector<4x256xf32>
    %cst_31 = arith.constant 0.000000e+00 : f32
    %84 = vector.broadcast %cst_31 : f32 to vector<4x1xf32>
    %85 = vector.extract_strided_slice %70 {offsets = [0, 0], sizes = [4, 255], strides = [1, 1]} : vector<4x256xf32> to vector<4x255xf32>
    %86 = tpu.concatenate %84, %85 in 1 : vector<4x1xf32>, vector<4x255xf32> -> vector<4x256xf32>
    %cst_32 = arith.constant 0.000000e+00 : f32
    %87 = vector.broadcast %cst_32 : f32 to vector<4x256xf32>
    %88 = arith.select %22, %86, %87 : vector<4x256xi1>, vector<4x256xf32>
    %89 = vector.extract_strided_slice %70 {offsets = [0, 1], sizes = [4, 255], strides = [1, 1]} : vector<4x256xf32> to vector<4x255xf32>
    %cst_33 = arith.constant 0.000000e+00 : f32
    %90 = vector.broadcast %cst_33 : f32 to vector<4x1xf32>
    %91 = tpu.concatenate %89, %90 in 1 : vector<4x255xf32>, vector<4x1xf32> -> vector<4x256xf32>
    %cst_34 = arith.constant 0.000000e+00 : f32
    %92 = vector.broadcast %cst_34 : f32 to vector<4x256xf32>
    %93 = arith.select %24, %91, %92 : vector<4x256xi1>, vector<4x256xf32>
    %94 = vector.extract_strided_slice %70 {offsets = [0, 15], sizes = [4, 241], strides = [1, 1]} : vector<4x256xf32> to vector<4x241xf32>
    %cst_35 = arith.constant 0.000000e+00 : f32
    %95 = vector.broadcast %cst_35 : f32 to vector<4x15xf32>
    %96 = tpu.concatenate %94, %95 in 1 : vector<4x241xf32>, vector<4x15xf32> -> vector<4x256xf32>
    %cst_36 = arith.constant 0.000000e+00 : f32
    %97 = vector.broadcast %cst_36 : f32 to vector<4x256xf32>
    %98 = arith.select %22, %96, %97 : vector<4x256xi1>, vector<4x256xf32>
    %99 = vector.extract_strided_slice %70 {offsets = [0, 16], sizes = [4, 240], strides = [1, 1]} : vector<4x256xf32> to vector<4x240xf32>
    %cst_37 = arith.constant 0.000000e+00 : f32
    %100 = vector.broadcast %cst_37 : f32 to vector<4x16xf32>
    %101 = tpu.concatenate %99, %100 in 1 : vector<4x240xf32>, vector<4x16xf32> -> vector<4x256xf32>
    %102 = vector.extract_strided_slice %70 {offsets = [0, 17], sizes = [4, 239], strides = [1, 1]} : vector<4x256xf32> to vector<4x239xf32>
    %cst_38 = arith.constant 0.000000e+00 : f32
    %103 = vector.broadcast %cst_38 : f32 to vector<4x17xf32>
    %104 = tpu.concatenate %102, %103 in 1 : vector<4x239xf32>, vector<4x17xf32> -> vector<4x256xf32>
    %cst_39 = arith.constant 0.000000e+00 : f32
    %105 = vector.broadcast %cst_39 : f32 to vector<4x256xf32>
    %106 = arith.select %24, %104, %105 : vector<4x256xi1>, vector<4x256xf32>
    %107 = tpu.concatenate %75, %78, %83, %88, %70, %93, %98, %101, %106 in 0 : vector<4x256xf32>, vector<4x256xf32>, vector<4x256xf32>, vector<4x256xf32>, vector<4x256xf32>, vector<4x256xf32>, vector<4x256xf32>, vector<4x256xf32>, vector<4x256xf32> -> vector<36x256xf32>
    %cst_40 = arith.constant dense<0.000000e+00> : vector<8x256xf32>
    %108 = tpu.matmul %0, %107, %cst_40 {dimension_numbers = #tpu.dot_dimension_numbers<[1], [0], [0], [1], [0, 0, 1, 1], [], []>} : vector<8x36xf32>, vector<36x256xf32>, vector<8x256xf32> -> vector<8x256xf32>
    %109 = tpu.concatenate %70, %108 in 0 : vector<4x256xf32>, vector<8x256xf32> -> vector<12x256xf32>
    %c1 = arith.constant 1 : index
    %c0_41 = arith.constant 0 : index
    %c0_42 = arith.constant 0 : index
    %110 = vector.load %arg3[%c1, %c0_41, %c0_42] : memref<2x12x256xf32, #tpu.memory_space<vmem>>, vector<1x12x256xf32>
    %111 = vector.shape_cast %110 : vector<1x12x256xf32> to vector<12x256xf32>
    %112 = vector.shape_cast %109 : vector<12x256xf32> to vector<1x12x256xf32>
    tpu.vector_store %arg3[%c1, %c0_41, %c0_42], %112 {strides = array<i32>} : memref<2x12x256xf32, #tpu.memory_space<vmem>>, vector<1x12x256xf32>,
    return
  }
  func.func @transform_0(%arg0: i32) -> (i32, i32, i32) {
    %c0_i32 = arith.constant 0 : i32
    %c0_i32_0 = arith.constant 0 : i32
    %c0_i32_1 = arith.constant 0 : i32
    %c0_i32_2 = arith.constant 0 : i32
    return %c0_i32, %c0_i32_0, %c0_i32_1 : i32, i32, i32
  }
  func.func @transform_1(%arg0: i32) -> (i32, i32) {
    %c0_i32 = arith.constant 0 : i32
    %c0_i32_0 = arith.constant 0 : i32
    %c0_i32_1 = arith.constant 0 : i32
    return %c0_i32, %c0_i32_0 : i32, i32
  }
  func.func @transform_2(%arg0: i32) -> (i32, i32, i32) {
    %c0_i32 = arith.constant 0 : i32
    %c0_i32_0 = arith.constant 0 : i32
    %c0_i32_1 = arith.constant 0 : i32
    %c0_i32_2 = arith.constant 0 : i32
    return %c0_i32, %c0_i32_0, %c0_i32_1 : i32, i32, i32
  }
}

</mosaic_0001>

<bundles_post_ra>
// kernel: tpu_custom_call.1
= control target key start
LH: loop header
LB: loop body
LE: loop exit
PB: predicated region body
PF: predicated region fallthrough
CT: control target
= control target key end

     0   :  { %7 = vsyncpa [#allocation3], 0  ;;  %s881_s0 = inlined_call_operand.hbm [shape: f32[2,4,256], index: 0, kind: input, shape index: {}]   ;;  %s882_s1 = inlined_call_operand.hbm [shape: f32[8,36], index: 1, kind: input, shape index: {}]   ;;  %s883_s2 = inlined_call_operand.vmem [shape: f32[2,12,256], index: 2, kind: output, shape index: {}]  }
   0x1   :  { %8 = vsyncpa [#allocation5], 0  ;;  %s642_s9 = smov [#allocation2]   ;;  %s594_s13 = scalar_lea.hbm %s881_s0, 256 }
   0x2   :  { %s14_s10 = sshll.u32 %s642_s9, 4  ;;  %p595_p0 = scmp.ne.s32.totalorder %s881_s0, %s594_s13  ;;  %s15_s10 = int_to_ptr.vmem [resolvable:$true] %s14_s10 }
   0x3   :  { %p598_p1 = scmp.lt.u32.totalorder %s594_s13, %s881_s0 }
   0x5   :  { %p600_p2 = pnand %p598_p1, %p595_p0 }
   0x7   :  { %603 = shalt.err (!%p600_p2)
}
   0x8   :  { %s604_s18 = scalar_lea.vmem %s15_s10, 256  ;;  %p609_p4 = scmp.lt.s32.totalorder %s15_s10, %s15_s10 }
   0x9   :  { %p605_p3 = scmp.ne.s32.totalorder %s15_s10, %s604_s18  ;;  %p610_p5 = scmp.lt.s32.totalorder %s604_s18, %s604_s18 }
   0xb   :  { %p611_p6 = por %p610_p5, %p609_p4 }
   0xd   :  { %p612_p7 = pnand %p611_p6, %p605_p3 }
   0xf   :  { %615 = shalt.err (!%p612_p7)
}
  0x10   :  { %s643_s19 = smov 128   ;;  %s644_s20 = smov 8  }
  0x11   :  { %20 = dma.hbm_to_vmem [thread:$0]  %s881_s0, 256, %s15_s10, [#allocation3], %s643_s19, %s643_s19, %s644_s20  }
  0x12   :  { %s645_s23 = smov [#allocation4]   ;;  %s616_s27 = scalar_lea.hbm %s882_s1, 128 }
  0x13   :  { %s27_s24 = sshll.u32 %s645_s23, 4  ;;  %p617_p8 = scmp.ne.s32.totalorder %s882_s1, %s616_s27  ;;  %s28_s24 = int_to_ptr.vmem [resolvable:$true] %s27_s24 }
  0x14   :  { %p620_p9 = scmp.lt.u32.totalorder %s616_s27, %s882_s1 }
  0x16   :  { %p622_p10 = pnand %p620_p9, %p617_p8 }
  0x18   :  { %625 = shalt.err (!%p622_p10)
}
  0x19   :  { %s626_s4 = scalar_lea.vmem %s28_s24, 128  ;;  %p631_p12 = scmp.lt.s32.totalorder %s28_s24, %s28_s24 }
  0x1a   :  { %p627_p11 = scmp.ne.s32.totalorder %s28_s24, %s626_s4  ;;  %p632_p13 = scmp.lt.s32.totalorder %s626_s4, %s626_s4 }
  0x1c   :  { %p633_p0 = por %p632_p13, %p631_p12 }
  0x1e   :  { %p634_p1 = pnand %p633_p0, %p627_p11 }
  0x20   :  { %637 = shalt.err (!%p634_p1)
}
  0x21   :  { %30 = dma.hbm_to_vmem [thread:$0]  %s882_s1, 128, %s28_s24, [#allocation5]  }
  0x22   :  { %638 = dma.done.wait [#allocation3], 256  }
  0x23   :  { %639 = vsyncadd [#allocation3], 4294967040 }
  0x24   :  { %640 = dma.done.wait [#allocation5], 128  }
  0x25   :  { %641 = vsyncadd [#allocation5], 4294967168  ;;  %v38_v0 = vld [vmem:[#allocation2] sm:$0xff]  ;;  %v39_v1 = vld [vmem:[#allocation2 + $0x8] sm:$0xff]  ;;  %s646_s1 = smov 16   ;;  %s647_s6 = smov 1   ;;  %v42_v11 = vlaneseq }
  0x26   :  { %v694_v2 = vmax.f32 %v38_v0, 0.0  ;;  %v696_v3 = vmax.f32 %v39_v1, 0.0  ;;  %s648_s7 = smov 15   ;;  %s649_s8 = smov 17   ;;  %v653_v10 = vmov 0.0   ;;  %vm90_vm0 = vcmask 130048  }
  0x27   :  { %s650_s9 = smov 127   ;;  %s651_s10 = smov 113   ;;  %263 = vmatprep.mubr.f32.mxu0 %v653_v10  ;;  %459 = vmatprep.mubr.f32.mxu1 %v653_v10  ;;  %v43_v12 = vand.u32 127, %v42_v11  ;;  %vm109_vm1 = vcmask 7168   ;;  %vm98_vm3 = vcmask 121856   ;;  %vm79_vm5 = vcmask 138240  }
  0x28   :  { %v700_v4 = vcombine.high %v694_v2, %v694_v2  ;;  %v704_v5 = vcombine.high %v696_v3, %v696_v3  ;;  %v569_v8 = vpack.i.bf16 %v696_v3, %v694_v2  ;;  %s652_s11 = smov 112   ;;  %s654_s12 = smov 111   ;;  %vm180_vm8 = vcmask 1043456  }
  0x29   :  { %v44_v13 = vadd.s32 128, %v43_v12  ;;  %v49_v14 = vand.u32 15, %v43_v12  ;;  %vm120_vm9 = vcmask 1039360   ;;  %vm131_vm10 = vcmask 924672  }
  0x2a   :  { %v534_v6 = vpack.i.bf16 %v700_v4, %v694_v2  ;;  %v539_v7 = vpack.i.bf16 %v704_v5, %v696_v3  ;;  %v564_v9 = vpack.i.bf16 %v704_v5, %v700_v4  ;;  %vm142_vm11 = vcmask 916480  }
  0x2b   :  { %v56_v15 = vand.u32 15, %v44_v13  ;;  %vm718_vm2 = vcmp.ne.s32.totalorder %v49_v14, 0  ;;  %vm732_vm6 = vcmp.ne.s32.totalorder %v49_v14, 15  ;;  %vm150_vm12 = vcmask 908288  }
  0x2c   :  { %535 = vrot.lane.b32.xlu1 %v534_v6, %s646_s1  ;;  %525 = vrot.lane.b32.xlu0 %v534_v6, %s647_s6  ;;  %vm189_vm13 = vcmask 293888  }
  0x2d   :  { %vm723_vm4 = vcmp.ne.s32.totalorder %v56_v15, 0  ;;  %vm736_vm7 = vcmp.ne.s32.totalorder %v56_v15, 15 }
  0x30   :  { %540 = vrot.lane.b32.xlu1 %v539_v7, %s646_s1  ;;  %530 = vrot.lane.b32.xlu0 %v539_v7, %s647_s6 }
  0x34   :  { %550 = vrot.lane.b32.xlu1 %v534_v6, %s648_s7  ;;  %545 = vrot.lane.b32.xlu0 %v534_v6, %s649_s8 }
  0x38   :  { %560 = vrot.lane.b32.xlu1 %v539_v7, %s648_s7  ;;  %555 = vrot.lane.b32.xlu0 %v539_v7, %s649_s8 }
  0x3c   :  { %570 = vrot.lane.b32.xlu1 %v569_v8, %s650_s9  ;;  %565 = vrot.lane.b32.xlu0 %v564_v9, %s650_s9 }
  0x40   :  { %580 = vrot.lane.b32.xlu1 %v564_v9, %s651_s10  ;;  %575 = vrot.lane.b32.xlu0 %v564_v9, %s652_s11 }
  0x44   :  { %590 = vrot.lane.b32.xlu1 %v569_v8, %s651_s10  ;;  %585 = vrot.lane.b32.xlu0 %v569_v8, %s652_s11 }
  0x48   :  { %350 = vrot.lane.b32.xlu1 %v704_v5, %s654_s12  ;;  %148 = vrot.lane.b32.xlu0 %v700_v4, %s654_s12 }
  0x4c   :  { %348 = vrot.lane.b32.xlu1 %v696_v3, %s654_s12  ;;  %146 = vrot.lane.b32.xlu0 %v694_v2, %s654_s12 }
  0x9e   :  { %v536_v16 = vpop.permute.xlu1 %535  ;;  %v526_v17 = vpop.permute.xlu0 %525 }
  0x9f   :  { %v538_v18 = vunpack.i.h.bf16 %v536_v16  ;;  %v537_v19 = vunpack.i.l.bf16 %v536_v16  ;;  %v528_v20 = vunpack.i.h.bf16 %v526_v17  ;;  %v527_v21 = vunpack.i.l.bf16 %v526_v17 }
  0xa1   :  { %v113_v23 = vsel %vm109_vm1, 0.0, %v527_v21  ;;  %v93_v25 = vsel %vm90_vm0, 0.0, %v537_v19  ;;  %v110_v26 = vsel %vm109_vm1, %v527_v21, %v528_v20  ;;  %v91_v29 = vsel %vm90_vm0, %v537_v19, %v538_v18 }
  0xa2   :  { %v541_v27 = vpop.permute.xlu1 %540  ;;  %v531_v28 = vpop.permute.xlu0 %530  ;;  %v114_v30 = vsel %vm718_vm2, %v113_v23, 0.0  ;;  %v158_v37 = vrot.slane %v93_v25, 4  ;;  %v115_v39 = vsel %vm723_vm4, %v110_v26, 0.0  ;;  %v159_v46 = vrot.slane %v91_v29, 4 }
  0xa3   :  { %v543_v31 = vunpack.i.h.bf16 %v541_v27  ;;  %v542_v32 = vunpack.i.l.bf16 %v541_v27  ;;  %v533_v33 = vunpack.i.h.bf16 %v531_v28  ;;  %v532_v34 = vunpack.i.l.bf16 %v531_v28 }
  0xa4   :  { %v164_v41 = vrot.slane %v114_v30, 4  ;;  %v165_v53 = vrot.slane %v115_v39, 4 }
  0xa5   :  { %v741_v38 = vsel %vm90_vm0, 0.0, %v542_v32  ;;  %v746_v40 = vsel %vm90_vm0, %v542_v32, %v543_v31  ;;  %v315_v42 = vsel %vm109_vm1, %v532_v34, %v533_v33  ;;  %v318_v43 = vsel %vm109_vm1, 0.0, %v532_v34 }
  0xa6   :  { %v551_v44 = vpop.permute.xlu1 %550  ;;  %v546_v45 = vpop.permute.xlu0 %545  ;;  %v319_v47 = vsel %vm718_vm2, %v318_v43, 0.0  ;;  %v359_v51 = vrot.slane %v741_v38, 4  ;;  %v360_v54 = vrot.slane %v746_v40, 4  ;;  %v320_v58 = vsel %vm723_vm4, %v315_v42, 0.0 }
  0xa7   :  { %v553_v48 = vunpack.i.h.bf16 %v551_v44  ;;  %v552_v49 = vunpack.i.l.bf16 %v551_v44  ;;  %v548_v50 = vunpack.i.h.bf16 %v546_v45  ;;  %v547_v52 = vunpack.i.l.bf16 %v546_v45 }
  0xa8   :  { %v754_v55 = vrot.slane %v319_v47, 4  ;;  %v366_v31 = vrot.slane %v320_v58, 4 }
  0xa9   :  { %v102_v56 = vsel %vm98_vm3, 0.0, %v552_v49  ;;  %v99_v57 = vsel %vm98_vm3, %v552_v49, %v553_v48  ;;  %v83_v59 = vsel %vm79_vm5, 0.0, %v547_v52  ;;  %v80_v62 = vsel %vm79_vm5, %v547_v52, %v548_v50 }
  0xaa   :  { %v561_v60 = vpop.permute.xlu1 %560  ;;  %v556_v61 = vpop.permute.xlu0 %555  ;;  %v104_v63 = vsel %vm736_vm7, %v99_v57, 0.0  ;;  %v103_v0 = vsel %vm732_vm6, %v102_v56, 0.0  ;;  %v85_v9 = vsel %vm723_vm4, %v80_v62, 0.0  ;;  %v84_v11 = vsel %vm718_vm2, %v83_v59, 0.0 }
  0xab   :  { %v563_v1 = vunpack.i.h.bf16 %v561_v60  ;;  %v562_v6 = vunpack.i.l.bf16 %v561_v60  ;;  %v558_v7 = vunpack.i.h.bf16 %v556_v61  ;;  %v557_v8 = vunpack.i.l.bf16 %v556_v61 }
  0xac   :  { %v184_v10 = vsel %vm180_vm8, %v104_v63, %v165_v53  ;;  %v183_v12 = vsel %vm180_vm8, %v103_v0, %v164_v41  ;;  %v182_v15 = vsel %vm180_vm8, %v85_v9, %v159_v46  ;;  %v181_v16 = vsel %vm180_vm8, %v84_v11, %v158_v37 }
  0xad   :  { %v308_v13 = vsel %vm98_vm3, 0.0, %v562_v6  ;;  %v291_v14 = vsel %vm79_vm5, 0.0, %v557_v8  ;;  %v495_v19 = vpack.c.bf16 %v184_v10, %v182_v15  ;;  %v497_v20 = vpack.c.bf16 %v183_v12, %v181_v16 }
  0xae   :  { %v571_v17 = vpop.permute.xlu1 %570  ;;  %v566_v18 = vpop.permute.xlu0 %565  ;;  %v288_v21 = vsel %vm79_vm5, %v557_v8, %v558_v7  ;;  %v305_v23 = vsel %vm98_vm3, %v562_v6, %v563_v1  ;;  %v292_v32 = vsel %vm718_vm2, %v291_v14, 0.0  ;;  %v309_v45 = vsel %vm732_vm6, %v308_v13, 0.0 }
  0xaf   :  { %v573_v25 = vunpack.i.h.bf16 %v571_v17  ;;  %v572_v26 = vunpack.i.l.bf16 %v571_v17  ;;  %v568_v27 = vunpack.i.h.bf16 %v566_v18  ;;  %v567_v28 = vunpack.i.l.bf16 %v566_v18  ;;  %496 = vmatprep.subr.bf16.mxu0 %v495_v19 }
  0xb0   :  { %v293_v29 = vsel %vm723_vm4, %v288_v21, 0.0  ;;  %v310_v30 = vsel %vm736_vm7, %v305_v23, 0.0  ;;  %498 = vmatpush1.bf16.msra.mxu0 %v497_v20  ;;  %v381_v59 = vsel %vm180_vm8, %v292_v32, %v359_v51  ;;  %v383_v60 = vsel %vm180_vm8, %v309_v45, %v754_v55 }
  0xb1   :  { %v325_v33 = vsel %vm120_vm9, %v573_v25, %v568_v27  ;;  %v328_v34 = vsel %vm120_vm9, %v568_v27, 0.0  ;;  %v121_v37 = vsel %vm120_vm9, %v572_v26, %v567_v28  ;;  %v124_v39 = vsel %vm120_vm9, %v567_v28, 0.0 }
  0xb2   :  { %v329_v40 = vsel %vm732_vm6, %v325_v33, 0.0  ;;  %v330_v41 = vsel %vm736_vm7, %v328_v34, 0.0  ;;  %v126_v42 = vsel %vm736_vm7, %v124_v39, 0.0  ;;  %v581_v43 = vpop.permute.xlu1 %580  ;;  %v576_v44 = vpop.permute.xlu0 %575  ;;  %v125_v48 = vsel %vm732_vm6, %v121_v37, 0.0 }
  0xb3   :  { %v372_v46 = vrot.slane %v329_v40, 4  ;;  %v373_v47 = vrot.slane %v330_v41, 4  ;;  %v172_v49 = vrot.slane %v126_v42, 4  ;;  %v583_v50 = vunpack.i.h.bf16 %v581_v43 }
  0xb4   :  { %v582_v52 = vunpack.i.l.bf16 %v581_v43  ;;  %v578_v53 = vunpack.i.h.bf16 %v576_v44  ;;  %v577_v56 = vunpack.i.l.bf16 %v576_v44  ;;  %v382_v57 = vsel %vm180_vm8, %v293_v29, %v360_v54 }
  0xb5   :  { %v384_v58 = vsel %vm180_vm8, %v310_v30, %v366_v31  ;;  %v171_v61 = vrot.slane %v125_v48, 4  ;;  %v338_v54 = vsel %vm131_vm10, %v583_v50, 0.0  ;;  %v505_v9 = vpack.c.bf16 %v383_v60, %v381_v59 }
  0xb6   :  { %v135_v62 = vsel %vm131_vm10, %v582_v52, 0.0  ;;  %v347_v63 = vsel %vm142_vm11, %v578_v53, 0.0  ;;  %v145_v0 = vsel %vm142_vm11, %v577_v56, 0.0  ;;  %v591_v1 = vpop.permute.xlu1 %590  ;;  %v586_v6 = vpop.permute.xlu0 %585  ;;  %v503_v51 = vpack.c.bf16 %v384_v58, %v382_v57 }
  0xb7   :  { %v137_v7 = vsel %vm723_vm4, %v135_v62, 0.0  ;;  %v378_v38 = vrot.slane %v347_v63, 4  ;;  %v177_v8 = vrot.slane %v145_v0, 4  ;;  %v593_v10 = vunpack.i.h.bf16 %v591_v1 }
  0xb8   :  { %v592_v55 = vunpack.i.l.bf16 %v591_v1  ;;  %v588_v11 = vunpack.i.h.bf16 %v586_v6  ;;  %v587_v12 = vunpack.i.l.bf16 %v586_v6  ;;  %v186_v13 = vsel %vm180_vm8, %v700_v4, %v172_v49  ;;  %504 = vmatprep.subr.bf16.mxu1 %v503_v51 }
  0xb9   :  { %v188_v14 = vsel %vm180_vm8, %v137_v7, %v177_v8  ;;  %v340_v15 = vsel %vm723_vm4, %v338_v54, 0.0  ;;  %v335_v17 = vsel %vm131_vm10, %v593_v10, %v583_v50  ;;  %506 = vmatpush1.bf16.msra.mxu1 %v505_v9  ;;  %v386_v25 = vsel %vm180_vm8, %v704_v5, %v373_v47 }
  0xba   :  { %v132_v16 = vsel %vm131_vm10, %v592_v55, %v582_v52  ;;  %v351_v18 = vpop.permute.xlu1 %350  ;;  %v149_v19 = vpop.permute.xlu0 %148  ;;  %v499_v20 = vpack.c.bf16 %v188_v14, %v186_v13  ;;  %v143_v21 = vsel %vm142_vm11, %v587_v12, %v577_v56  ;;  %v345_v23 = vsel %vm142_vm11, %v588_v11, %v578_v53 }
  0xbb   :  { %v176_v26 = vrot.slane %v143_v21, 4  ;;  %v377_v27 = vrot.slane %v345_v23, 4  ;;  %v355_v24 = vsel %vm150_vm12, %v351_v18, 0.0  ;;  %v154_v28 = vsel %vm150_vm12, %v149_v19, 0.0 }
  0xbc   :  { %500 = vmatprep.subr.bf16.mxu0 %v499_v20  ;;  %v388_v29 = vsel %vm180_vm8, %v340_v15, %v378_v38  ;;  %v136_v30 = vsel %vm718_vm2, %v132_v16, 0.0  ;;  %v185_v31 = vsel %vm180_vm8, %v694_v2, %v171_v61  ;;  %v339_v32 = vsel %vm718_vm2, %v335_v17, 0.0 }
  0xbd   :  { %v507_v33 = vpack.c.bf16 %v388_v29, %v386_v25  ;;  %v187_v39 = vsel %vm180_vm8, %v136_v30, %v176_v26  ;;  %v385_v40 = vsel %vm180_vm8, %v696_v3, %v372_v46  ;;  %v387_v41 = vsel %vm180_vm8, %v339_v32, %v377_v27  ;;  %v37_v46 = vld [vmem:[#allocation4] sm:$0xff] }
  0xbe   :  { %v349_v34 = vpop.permute.xlu1 %348  ;;  %v147_v37 = vpop.permute.xlu0 %146  ;;  %v357_v42 = vsel %vm736_vm7, %v355_v24, 0.0  ;;  %v156_v43 = vsel %vm736_vm7, %v154_v28, 0.0  ;;  %v501_v44 = vpack.c.bf16 %v187_v39, %v185_v31  ;;  %v509_v45 = vpack.c.bf16 %v387_v41, %v385_v40 }
  0xbf   :  { %508 = vmatprep.subr.bf16.mxu1 %v507_v33  ;;  %v352_v22 = vsel %vm150_vm12, %v349_v34, %v351_v18  ;;  %v151_v47 = vsel %vm150_vm12, %v147_v37, %v149_v19 }
  0xc0   :  { %502 = vmatpush1.bf16.msra.mxu0 %v501_v44  ;;  %510 = vmatpush1.bf16.msra.mxu1 %v509_v45  ;;  %v356_v48 = vsel %vm732_vm6, %v352_v22, 0.0  ;;  %v155_v36 = vsel %vm732_vm6, %v151_v47, 0.0 }
  0xc1   :  { %485 = vmatprep.subr.msk.mxu0 %vm180_vm8, %v156_v43  ;;  %488 = vmatprep.subr.msk.mxu1 %vm180_vm8, %v357_v42 }
  0xc4   :  { %486 = vmatpush1.msk.msra.mxu0 %vm180_vm8, %v155_v36  ;;  %489 = vmatpush1.msk.msra.mxu1 %vm180_vm8, %v356_v48 }
  0xc5   :  { %487 = vmatmul.mubr.msk.f32.vlgmr.msra.gmra.mrb[0].mxu0 %vm189_vm13, %v37_v46  ;;  %490 = vmatmul.mubr.msk.f32.vlgmr.msra.gmra.mrb[0].mxu1 %vm189_vm13, %v37_v46 }
 0x198   :  { %v265_v49 = vpop.f32.mrb[0].mxu0  ;;  %v461_v50 = vpop.f32.mrb[0].mxu1 }
 0x199   :  { %v272_v52 = vrot.slane %v265_v49, 4  ;;  %v468_v53 = vrot.slane %v461_v50, 4  ;;  %v267_v56 = vpop.f32.mrb[1].mxu0  ;;  %v463_v57 = vpop.f32.mrb[1].mxu1 }
 0x19a   :  { %v273_v58 = vrot.slane %v267_v56, 4  ;;  %v469_v59 = vrot.slane %v463_v57, 4 }
 0x19b   :  { %v276_v60 = vsel %vm180_vm8, %v694_v2, %v272_v52  ;;  %280 = vst [vmem:[%s883_s2 + $0x10] sm:$0xf] %v272_v52  ;;  %v472_v35 = vsel %vm180_vm8, %v696_v3, %v468_v53  ;;  %493 = vst [vmem:[%s883_s2 + $0x30] sm:$0xf] %v468_v53 }
 0x19c   :  { %278 = vst [vmem:[%s883_s2] sm:$0xff] %v276_v60  ;;  %491 = vst [vmem:[%s883_s2 + $0x20] sm:$0xff] %v472_v35  ;;  %v277_v2 = vsel %vm180_vm8, %v700_v4, %v273_v58  ;;  %v473_v3 = vsel %vm180_vm8, %v704_v5, %v469_v59 }
 0x19d   :  { %281 = vst [vmem:[%s883_s2 + $0x18] sm:$0xf] %v273_v58  ;;  %494 = vst [vmem:[%s883_s2 + $0x38] sm:$0xf] %v469_v59 }
 0x19e   :  { %279 = vst [vmem:[%s883_s2 + $0x8] sm:$0xff] %v277_v2  ;;  %492 = vst [vmem:[%s883_s2 + $0x28] sm:$0xff] %v473_v3 }
 0x19f   :  { %483 = vsyncpa [#allocation3], 1 }
 0x1a0   :  { %484 = vsyncpa [#allocation5], 1 }

</bundles_post_ra>
